<compile_context>
chip_gen: v7x
topology: tpu7x:2x2x1
jax: 0.10.0
libtpu: 0.0.40
codegen_flags: <defaults>
</compile_context>

<pallas_src>
import functools
import math

import jax
import jax.numpy as jnp
from jax.experimental import pallas as pl
from jax.experimental.pallas import tpu as pltpu

# --- model config (CFG.target_size analog + small swin-style dims) -----------------
PATCH = 4
EMBED_DIM = 32
MLP_HIDDEN = 64
TARGET_SIZE = 5
HEAD_PAD = 128          # lane-dense head/output width; sliced back to TARGET_SIZE outside
BF = jnp.bfloat16

PARAM_ORDER = [
    "we", "be",
    "g1", "b1",
    "wq", "wk", "wv", "wo",
    "g2", "b2",
    "w1", "bb1", "w2", "bb2",
    "g3", "b3",
    "wh", "bh",
]


def _layer_norm(x, g, b, eps=1e-5):
    mu = jnp.mean(x, axis=-1, keepdims=True)
    var = jnp.mean(jnp.square(x - mu), axis=-1, keepdims=True)
    return (x - mu) * jax.lax.rsqrt(var + eps) * g + b


def triplet_kernel(tok_ref,
                   we_ref, be_ref,
                   g1_ref, b1_ref,
                   wq_ref, wk_ref, wv_ref, wo_ref,
                   g2_ref, b2_ref,
                   w1_ref, bb1_ref, w2_ref, bb2_ref,
                   g3_ref, b3_ref,
                   wh_ref, bh_ref,
                   out_ref,
                   *, b_tile, n_tok, out_rows):
    D = EMBED_DIM
    tok = tok_ref[0]                                     # (M, patch_dim) bf16, M = b_tile*N

    # Patch embedding == Conv2d(C, D, kernel=P, stride=P) on flattened patches,
    # applied to ALL images in the tile at once (batch folded into M).
    x = jnp.dot(tok, we_ref[...], preferred_element_type=jnp.float32) + be_ref[...]

    # --- attention block (pre-LN, single head, batched per-image) --------------------
    h = _layer_norm(x, g1_ref[...], b1_ref[...])
    h_bf = h.astype(BF)
    q = jnp.dot(h_bf, wq_ref[...], preferred_element_type=jnp.float32)
    k = jnp.dot(h_bf, wk_ref[...], preferred_element_type=jnp.float32)
    v = jnp.dot(h_bf, wv_ref[...], preferred_element_type=jnp.float32)

    scale = 1.0 / math.sqrt(D)
    qb = (q * scale).astype(BF).reshape(b_tile, n_tok, D)
    kb = k.astype(BF).reshape(b_tile, n_tok, D)
    vb = v.astype(BF).reshape(b_tile, n_tok, D)

    # Per-image scores: (b_tile, N, N) — no cross-image mask / bias needed.
    s = jnp.einsum('bqd,bkd->bqk', qb, kb, preferred_element_type=jnp.float32)
    s = s - jnp.max(s, axis=-1, keepdims=True)
    p = jnp.exp(s)
    inv = 1.0 / jnp.sum(p, axis=-1, keepdims=True)       # one exact divide per row
    p = p * inv
    attn = jnp.einsum('bqk,bkd->bqd', p.astype(BF), vb,
                      preferred_element_type=jnp.float32)           # (b_tile, N, D)
    attn = attn.reshape(b_tile * n_tok, D)
    attn = jnp.dot(attn.astype(BF), wo_ref[...], preferred_element_type=jnp.float32)
    x = x + attn

    # --- MLP block --------------------------------------------------------------------
    h = _layer_norm(x, g2_ref[...], b2_ref[...])
    h = jnp.dot(h.astype(BF), w1_ref[...], preferred_element_type=jnp.float32) + bb1_ref[...]
    h = jax.nn.gelu(h, approximate=True)
    h = jnp.dot(h.astype(BF), w2_ref[...], preferred_element_type=jnp.float32) + bb2_ref[...]
    x = x + h

    # --- final norm, per-image mean pool, linear head ----------------------------------
    x = _layer_norm(x, g3_ref[...], b3_ref[...])
    pooled = jnp.mean(x.reshape(b_tile, n_tok, D), axis=1)          # (b_tile, D)
    logits = (jnp.dot(pooled.astype(BF), wh_ref[...],
                      preferred_element_type=jnp.float32) + bh_ref[...])   # (b_tile, 128)

    if b_tile == out_rows:
        out_ref[0] = logits
    else:
        out_ref[0] = jnp.zeros((out_rows, HEAD_PAD), jnp.float32)   # pad rows (sliced off)
        out_ref[0, 0:b_tile, :] = logits


def patchify(x):
    # x is NCHW (B, C, H, W) -> tokens (B, N, C*P*P), N = (H/P)*(W/P)
    B, C, H, W = x.shape
    x = x.reshape(B, C, H // PATCH, PATCH, W // PATCH, PATCH)
    x = x.transpose(0, 2, 4, 1, 3, 5)
    return x.reshape(B, (H // PATCH) * (W // PATCH), C * PATCH * PATCH).astype(jnp.float32)


def init_params(key, patch_dim):
    ks = jax.random.split(key, 8)

    def w(k, shape, scale=0.02):
        return (scale * jax.random.normal(k, shape)).astype(jnp.float32)

    D, Hd, T = EMBED_DIM, MLP_HIDDEN, TARGET_SIZE
    f32 = jnp.float32
    return dict(
        we=w(ks[0], (patch_dim, D)), be=jnp.zeros((1, D), f32),
        g1=jnp.ones((1, D), f32), b1=jnp.zeros((1, D), f32),
        wq=w(ks[1], (D, D)), wk=w(ks[2], (D, D)),
        wv=w(ks[3], (D, D)), wo=w(ks[4], (D, D)),
        g2=jnp.ones((1, D), f32), b2=jnp.zeros((1, D), f32),
        w1=w(ks[5], (D, Hd)), bb1=jnp.zeros((1, Hd), f32),
        w2=w(ks[6], (Hd, D)), bb2=jnp.zeros((1, D), f32),
        g3=jnp.ones((1, D), f32), b3=jnp.zeros((1, D), f32),
        wh=w(ks[7], (D, T)), bh=jnp.zeros((1, T), f32),
    )


def _pick_batch_tile(batch, n_tok, row_target=256, row_cap=2048):
    # Generation-aware batch-tile heuristic:
    #  * prefer >=2 grid steps when the batch allows it (v7x has 2 TensorCores and
    #    dimension_semantics=("parallel",) only helps with >=2 steps);
    #  * within that, pick the smallest tile that reaches ~256 rows per step
    #    (256-wide MXU on v6e/v7x, amortizes per-grid-step overhead);
    #  * cap rows per step (attention is now linear in M, so VMEM use is linear too).
    divisors = [t for t in range(1, batch + 1) if batch % t == 0 and t * n_tok <= row_cap]
    if not divisors:
        divisors = [1]
    multi = [t for t in divisors if batch // t >= 2]
    pool = multi if multi else divisors
    for t in pool:
        if t * n_tok >= row_target:
            return t
    return pool[-1]


@jax.jit
def triplet_forward(x, params):
    tokens = patchify(x)                                   # (B, N, PD) f32
    B, N, PD = tokens.shape
    b_tile = _pick_batch_tile(B, N)
    n_tiles = B // b_tile
    M = b_tile * N
    out_rows = ((b_tile + 7) // 8) * 8                     # sublane-aligned output rows

    tokens = tokens.reshape(n_tiles, M, PD).astype(BF)

    # bf16 matmul operands; lane-dense (128-wide) padded head. Biases / LN params stay f32.
    pdict = dict(params)
    for name in ("we", "wq", "wk", "wv", "wo", "w1", "w2"):
        pdict[name] = params[name].astype(BF)
    pdict["wh"] = jnp.pad(params["wh"],
                          ((0, 0), (0, HEAD_PAD - TARGET_SIZE))).astype(BF)      # (D, 128)
    pdict["bh"] = jnp.pad(params["bh"], ((0, 0), (0, HEAD_PAD - TARGET_SIZE)))   # (1, 128)
    plist = [pdict[k] for k in PARAM_ORDER]

    def full_spec(arr):
        return pl.BlockSpec(arr.shape, lambda i, _n=arr.ndim: (0,) * _n)

    in_specs = ([pl.BlockSpec((1, M, PD), lambda i: (i, 0, 0))]
                + [full_spec(p) for p in plist])
    # Per-tile, sublane-aligned, lane-dense output block -> unmasked vst writeback and
    # safe "parallel" grid axis (v7x megacore).
    out_spec = pl.BlockSpec((1, out_rows, HEAD_PAD), lambda i: (i, 0, 0))

    kernel = functools.partial(triplet_kernel, b_tile=b_tile, n_tok=N, out_rows=out_rows)

    out3d = pl.pallas_call(
        kernel,
        out_shape=jax.ShapeDtypeStruct((n_tiles, out_rows, HEAD_PAD), jnp.float32),
        grid=(n_tiles,),
        in_specs=in_specs,
        out_specs=out_spec,
        compiler_params=pltpu.CompilerParams(dimension_semantics=("parallel",)),
    )(tokens, *plist)

    return out3d[:, :b_tile, :TARGET_SIZE].reshape(B, TARGET_SIZE)


if __name__ == "__main__":
    key = jax.random.PRNGKey(0)
    kx, kp = jax.random.split(key)

    # NCHW input, matching the PyTorch module's expected layout.
    x = jax.random.normal(kx, (2, 3, 16, 16), dtype=jnp.float32)
    params = init_params(kp, 3 * PATCH * PATCH)

    out = triplet_forward(x, params)
    jax.block_until_ready(out)
    assert out.shape == (2, TARGET_SIZE), out.shape
    assert bool(jnp.all(jnp.isfinite(out)))
    print("KERNEL_OK")
</pallas_src>

<mosaic_0001>
module attributes {stable_mosaic.version = 11 : i64} {
  func.func @triplet_kernel(%arg0: i32, %arg1: memref<1x16x48xbf16, #tpu.memory_space<vmem>>, %arg2: memref<48x32xbf16, #tpu.memory_space<vmem>>, %arg3: memref<1x32xf32, #tpu.memory_space<vmem>>, %arg4: memref<1x32xf32, #tpu.memory_space<vmem>>, %arg5: memref<1x32xf32, #tpu.memory_space<vmem>>, %arg6: memref<32x32xbf16, #tpu.memory_space<vmem>>, %arg7: memref<32x32xbf16, #tpu.memory_space<vmem>>, %arg8: memref<32x32xbf16, #tpu.memory_space<vmem>>, %arg9: memref<32x32xbf16, #tpu.memory_space<vmem>>, %arg10: memref<1x32xf32, #tpu.memory_space<vmem>>, %arg11: memref<1x32xf32, #tpu.memory_space<vmem>>, %arg12: memref<32x64xbf16, #tpu.memory_space<vmem>>, %arg13: memref<1x64xf32, #tpu.memory_space<vmem>>, %arg14: memref<64x32xbf16, #tpu.memory_space<vmem>>, %arg15: memref<1x32xf32, #tpu.memory_space<vmem>>, %arg16: memref<1x32xf32, #tpu.memory_space<vmem>>, %arg17: memref<1x32xf32, #tpu.memory_space<vmem>>, %arg18: memref<32x128xbf16, #tpu.memory_space<vmem>>, %arg19: memref<1x128xf32, #tpu.memory_space<vmem>>, %arg20: memref<1x8x128xf32, #tpu.memory_space<vmem>>) attributes {dimension_semantics = [#tpu.dimension_semantics<parallel>], iteration_bounds = array<i64: 2>, scalar_prefetch = 0 : i64, scratch_operands = 0 : i64, tpu.core_type = #tpu.core_type<tc>, window_params = [{transform_indices = @transform_0, window_bounds = array<i64: 1, 16, 48>}, {pipeline_mode = #tpu.pipeline_mode<synchronous>, transform_indices = @transform_1, window_bounds = array<i64: 48, 32>}, {pipeline_mode = #tpu.pipeline_mode<synchronous>, transform_indices = @transform_2, window_bounds = array<i64: 1, 32>}, {pipeline_mode = #tpu.pipeline_mode<synchronous>, transform_indices = @transform_3, window_bounds = array<i64: 1, 32>}, {pipeline_mode = #tpu.pipeline_mode<synchronous>, transform_indices = @transform_4, window_bounds = array<i64: 1, 32>}, {pipeline_mode = #tpu.pipeline_mode<synchronous>, transform_indices = @transform_5, window_bounds = array<i64: 32, 32>}, {pipeline_mode = #tpu.pipeline_mode<synchronous>, transform_indices = @transform_6, window_bounds = array<i64: 32, 32>}, {pipeline_mode = #tpu.pipeline_mode<synchronous>, transform_indices = @transform_7, window_bounds = array<i64: 32, 32>}, {pipeline_mode = #tpu.pipeline_mode<synchronous>, transform_indices = @transform_8, window_bounds = array<i64: 32, 32>}, {pipeline_mode = #tpu.pipeline_mode<synchronous>, transform_indices = @transform_9, window_bounds = array<i64: 1, 32>}, {pipeline_mode = #tpu.pipeline_mode<synchronous>, transform_indices = @transform_10, window_bounds = array<i64: 1, 32>}, {pipeline_mode = #tpu.pipeline_mode<synchronous>, transform_indices = @transform_11, window_bounds = array<i64: 32, 64>}, {pipeline_mode = #tpu.pipeline_mode<synchronous>, transform_indices = @transform_12, window_bounds = array<i64: 1, 64>}, {pipeline_mode = #tpu.pipeline_mode<synchronous>, transform_indices = @transform_13, window_bounds = array<i64: 64, 32>}, {pipeline_mode = #tpu.pipeline_mode<synchronous>, transform_indices = @transform_14, window_bounds = array<i64: 1, 32>}, {pipeline_mode = #tpu.pipeline_mode<synchronous>, transform_indices = @transform_15, window_bounds = array<i64: 1, 32>}, {pipeline_mode = #tpu.pipeline_mode<synchronous>, transform_indices = @transform_16, window_bounds = array<i64: 1, 32>}, {pipeline_mode = #tpu.pipeline_mode<synchronous>, transform_indices = @transform_17, window_bounds = array<i64: 32, 128>}, {pipeline_mode = #tpu.pipeline_mode<synchronous>, transform_indices = @transform_18, window_bounds = array<i64: 1, 128>}, {transform_indices = @transform_19, window_bounds = array<i64: 1, 8, 128>}]} {
    %c0 = arith.constant 0 : index
    %c0_0 = arith.constant 0 : index
    %c0_1 = arith.constant 0 : index
    %0 = vector.load %arg1[%c0, %c0_0, %c0_1] : memref<1x16x48xbf16, #tpu.memory_space<vmem>>, vector<1x16x48xbf16>
    %1 = vector.shape_cast %0 : vector<1x16x48xbf16> to vector<16x48xbf16>
    %c0_2 = arith.constant 0 : index
    %c0_3 = arith.constant 0 : index
    %2 = vector.load %arg2[%c0_2, %c0_3] : memref<48x32xbf16, #tpu.memory_space<vmem>>, vector<48x32xbf16>
    %cst = arith.constant dense<0.000000e+00> : vector<16x32xf32>
    %3 = tpu.matmul %1, %2, %cst {dimension_numbers = #tpu.dot_dimension_numbers<[1], [0], [0], [1], [0, 0, 1, 1], [], []>} : vector<16x48xbf16>, vector<48x32xbf16>, vector<16x32xf32> -> vector<16x32xf32>
    %c0_4 = arith.constant 0 : index
    %c0_5 = arith.constant 0 : index
    %4 = vector.load %arg3[%c0_4, %c0_5] : memref<1x32xf32, #tpu.memory_space<vmem>>, vector<1x32xf32>
    %5 = vector.broadcast %4 : vector<1x32xf32> to vector<16x32xf32>
    %6 = arith.addf %3, %5 : vector<16x32xf32>
    %c0_6 = arith.constant 0 : index
    %c0_7 = arith.constant 0 : index
    %7 = vector.load %arg4[%c0_6, %c0_7] : memref<1x32xf32, #tpu.memory_space<vmem>>, vector<1x32xf32>
    %c0_8 = arith.constant 0 : index
    %c0_9 = arith.constant 0 : index
    %8 = vector.load %arg5[%c0_8, %c0_9] : memref<1x32xf32, #tpu.memory_space<vmem>>, vector<1x32xf32>
    %cst_10 = arith.constant dense<0.000000e+00> : vector<16xf32>
    %9 = vector.multi_reduction <add>, %6, %cst_10 [1] : vector<16x32xf32> to vector<16xf32>
    %10 = vector.shape_cast %9 : vector<16xf32> to vector<16x1xf32>
    %cst_11 = arith.constant 3.200000e+01 : f32
    %11 = vector.broadcast %cst_11 : f32 to vector<16x1xf32>
    %12 = arith.divf %10, %11 : vector<16x1xf32>
    %13 = vector.broadcast %12 : vector<16x1xf32> to vector<16x32xf32>
    %14 = arith.subf %6, %13 : vector<16x32xf32>
    %15 = arith.mulf %14, %14 : vector<16x32xf32>
    %cst_12 = arith.constant dense<0.000000e+00> : vector<16xf32>
    %16 = vector.multi_reduction <add>, %15, %cst_12 [1] : vector<16x32xf32> to vector<16xf32>
    %17 = vector.shape_cast %16 : vector<16xf32> to vector<16x1xf32>
    %cst_13 = arith.constant 3.200000e+01 : f32
    %18 = vector.broadcast %cst_13 : f32 to vector<16x1xf32>
    %19 = arith.divf %17, %18 : vector<16x1xf32>
    %20 = vector.broadcast %12 : vector<16x1xf32> to vector<16x32xf32>
    %21 = arith.subf %6, %20 : vector<16x32xf32>
    %cst_14 = arith.constant 9.99999974E-6 : f32
    %22 = vector.broadcast %cst_14 : f32 to vector<16x1xf32>
    %23 = arith.addf %19, %22 : vector<16x1xf32>
    %24 = math.rsqrt %23 : vector<16x1xf32>
    %25 = vector.broadcast %24 : vector<16x1xf32> to vector<16x32xf32>
    %26 = arith.mulf %21, %25 : vector<16x32xf32>
    %27 = vector.broadcast %7 : vector<1x32xf32> to vector<16x32xf32>
    %28 = arith.mulf %26, %27 : vector<16x32xf32>
    %29 = vector.broadcast %8 : vector<1x32xf32> to vector<16x32xf32>
    %30 = arith.addf %28, %29 : vector<16x32xf32>
    %31 = arith.truncf %30 : vector<16x32xf32> to vector<16x32xbf16>
    %c0_15 = arith.constant 0 : index
    %c0_16 = arith.constant 0 : index
    %32 = vector.load %arg6[%c0_15, %c0_16] : memref<32x32xbf16, #tpu.memory_space<vmem>>, vector<32x32xbf16>
    %cst_17 = arith.constant dense<0.000000e+00> : vector<16x32xf32>
    %33 = tpu.matmul %31, %32, %cst_17 {dimension_numbers = #tpu.dot_dimension_numbers<[1], [0], [0], [1], [0, 0, 1, 1], [], []>} : vector<16x32xbf16>, vector<32x32xbf16>, vector<16x32xf32> -> vector<16x32xf32>
    %c0_18 = arith.constant 0 : index
    %c0_19 = arith.constant 0 : index
    %34 = vector.load %arg7[%c0_18, %c0_19] : memref<32x32xbf16, #tpu.memory_space<vmem>>, vector<32x32xbf16>
    %cst_20 = arith.constant dense<0.000000e+00> : vector<16x32xf32>
    %35 = tpu.matmul %31, %34, %cst_20 {dimension_numbers = #tpu.dot_dimension_numbers<[1], [0], [0], [1], [0, 0, 1, 1], [], []>} : vector<16x32xbf16>, vector<32x32xbf16>, vector<16x32xf32> -> vector<16x32xf32>
    %c0_21 = arith.constant 0 : index
    %c0_22 = arith.constant 0 : index
    %36 = vector.load %arg8[%c0_21, %c0_22] : memref<32x32xbf16, #tpu.memory_space<vmem>>, vector<32x32xbf16>
    %cst_23 = arith.constant dense<0.000000e+00> : vector<16x32xf32>
    %37 = tpu.matmul %31, %36, %cst_23 {dimension_numbers = #tpu.dot_dimension_numbers<[1], [0], [0], [1], [0, 0, 1, 1], [], []>} : vector<16x32xbf16>, vector<32x32xbf16>, vector<16x32xf32> -> vector<16x32xf32>
    %cst_24 = arith.constant 0.176776692 : f32
    %38 = vector.broadcast %cst_24 : f32 to vector<16x32xf32>
    %39 = arith.mulf %33, %38 : vector<16x32xf32>
    %40 = arith.truncf %39 : vector<16x32xf32> to vector<16x32xbf16>
    %41 = vector.shape_cast %40 : vector<16x32xbf16> to vector<1x16x32xbf16>
    %42 = arith.truncf %35 : vector<16x32xf32> to vector<16x32xbf16>
    %43 = vector.shape_cast %42 : vector<16x32xbf16> to vector<1x16x32xbf16>
    %44 = arith.truncf %37 : vector<16x32xf32> to vector<16x32xbf16>
    %45 = vector.shape_cast %44 : vector<16x32xbf16> to vector<1x16x32xbf16>
    "tpu.trace_start"() <{level = 10 : i32, message = "bqd,bkd->bqk"}> : () -> ()
    %cst_25 = arith.constant dense<0.000000e+00> : vector<1x16x16xf32>
    %46 = tpu.matmul %41, %43, %cst_25 {dimension_numbers = #tpu.dot_dimension_numbers<[2], [2], [1], [1], [0, 0, 0, 1, 1, 1], [0], [0]>} : vector<1x16x32xbf16>, vector<1x16x32xbf16>, vector<1x16x16xf32> -> vector<1x16x16xf32>
    "tpu.trace_stop"() : () -> ()
    %cst_26 = arith.constant dense<0xFF800000> : vector<1x16xf32>
    %47 = vector.multi_reduction <maximumf>, %46, %cst_26 [2] : vector<1x16x16xf32> to vector<1x16xf32>
    %48 = vector.shape_cast %47 : vector<1x16xf32> to vector<1x16x1xf32>
    %49 = vector.broadcast %48 : vector<1x16x1xf32> to vector<1x16x16xf32>
    %50 = arith.subf %46, %49 : vector<1x16x16xf32>
    %51 = math.exp %50 : vector<1x16x16xf32>
    %cst_27 = arith.constant dense<0.000000e+00> : vector<1x16xf32>
    %52 = vector.multi_reduction <add>, %51, %cst_27 [2] : vector<1x16x16xf32> to vector<1x16xf32>
    %53 = vector.shape_cast %52 : vector<1x16xf32> to vector<1x16x1xf32>
    %cst_28 = arith.constant 1.000000e+00 : f32
    %54 = vector.broadcast %cst_28 : f32 to vector<1x16x1xf32>
    %55 = arith.divf %54, %53 : vector<1x16x1xf32>
    %56 = vector.broadcast %55 : vector<1x16x1xf32> to vector<1x16x16xf32>
    %57 = arith.mulf %51, %56 : vector<1x16x16xf32>
    %58 = arith.truncf %57 : vector<1x16x16xf32> to vector<1x16x16xbf16>
    "tpu.trace_start"() <{level = 10 : i32, message = "bqk,bkd->bqd"}> : () -> ()
    %cst_29 = arith.constant dense<0.000000e+00> : vector<1x16x32xf32>
    %59 = tpu.matmul %58, %45, %cst_29 {dimension_numbers = #tpu.dot_dimension_numbers<[2], [1], [1], [2], [0, 0, 0, 1, 1, 2], [0], [0]>} : vector<1x16x16xbf16>, vector<1x16x32xbf16>, vector<1x16x32xf32> -> vector<1x16x32xf32>
    "tpu.trace_stop"() : () -> ()
    %60 = vector.shape_cast %59 : vector<1x16x32xf32> to vector<16x32xf32>
    %61 = arith.truncf %60 : vector<16x32xf32> to vector<16x32xbf16>
    %c0_30 = arith.constant 0 : index
    %c0_31 = arith.constant 0 : index
    %62 = vector.load %arg9[%c0_30, %c0_31] : memref<32x32xbf16, #tpu.memory_space<vmem>>, vector<32x32xbf16>
    %cst_32 = arith.constant dense<0.000000e+00> : vector<16x32xf32>
    %63 = tpu.matmul %61, %62, %cst_32 {dimension_numbers = #tpu.dot_dimension_numbers<[1], [0], [0], [1], [0, 0, 1, 1], [], []>} : vector<16x32xbf16>, vector<32x32xbf16>, vector<16x32xf32> -> vector<16x32xf32>
    %64 = arith.addf %6, %63 : vector<16x32xf32>
    %c0_33 = arith.constant 0 : index
    %c0_34 = arith.constant 0 : index
    %65 = vector.load %arg10[%c0_33, %c0_34] : memref<1x32xf32, #tpu.memory_space<vmem>>, vector<1x32xf32>
    %c0_35 = arith.constant 0 : index
    %c0_36 = arith.constant 0 : index
    %66 = vector.load %arg11[%c0_35, %c0_36] : memref<1x32xf32, #tpu.memory_space<vmem>>, vector<1x32xf32>
    %cst_37 = arith.constant dense<0.000000e+00> : vector<16xf32>
    %67 = vector.multi_reduction <add>, %64, %cst_37 [1] : vector<16x32xf32> to vector<16xf32>
    %68 = vector.shape_cast %67 : vector<16xf32> to vector<16x1xf32>
    %cst_38 = arith.constant 3.200000e+01 : f32
    %69 = vector.broadcast %cst_38 : f32 to vector<16x1xf32>
    %70 = arith.divf %68, %69 : vector<16x1xf32>
    %71 = vector.broadcast %70 : vector<16x1xf32> to vector<16x32xf32>
    %72 = arith.subf %64, %71 : vector<16x32xf32>
    %73 = arith.mulf %72, %72 : vector<16x32xf32>
    %cst_39 = arith.constant dense<0.000000e+00> : vector<16xf32>
    %74 = vector.multi_reduction <add>, %73, %cst_39 [1] : vector<16x32xf32> to vector<16xf32>
    %75 = vector.shape_cast %74 : vector<16xf32> to vector<16x1xf32>
    %cst_40 = arith.constant 3.200000e+01 : f32
    %76 = vector.broadcast %cst_40 : f32 to vector<16x1xf32>
    %77 = arith.divf %75, %76 : vector<16x1xf32>
    %78 = vector.broadcast %70 : vector<16x1xf32> to vector<16x32xf32>
    %79 = arith.subf %64, %78 : vector<16x32xf32>
    %cst_41 = arith.constant 9.99999974E-6 : f32
    %80 = vector.broadcast %cst_41 : f32 to vector<16x1xf32>
    %81 = arith.addf %77, %80 : vector<16x1xf32>
    %82 = math.rsqrt %81 : vector<16x1xf32>
    %83 = vector.broadcast %82 : vector<16x1xf32> to vector<16x32xf32>
    %84 = arith.mulf %79, %83 : vector<16x32xf32>
    %85 = vector.broadcast %65 : vector<1x32xf32> to vector<16x32xf32>
    %86 = arith.mulf %84, %85 : vector<16x32xf32>
    %87 = vector.broadcast %66 : vector<1x32xf32> to vector<16x32xf32>
    %88 = arith.addf %86, %87 : vector<16x32xf32>
    %89 = arith.truncf %88 : vector<16x32xf32> to vector<16x32xbf16>
    %c0_42 = arith.constant 0 : index
    %c0_43 = arith.constant 0 : index
    %90 = vector.load %arg12[%c0_42, %c0_43] : memref<32x64xbf16, #tpu.memory_space<vmem>>, vector<32x64xbf16>
    %cst_44 = arith.constant dense<0.000000e+00> : vector<16x64xf32>
    %91 = tpu.matmul %89, %90, %cst_44 {dimension_numbers = #tpu.dot_dimension_numbers<[1], [0], [0], [1], [0, 0, 1, 1], [], []>} : vector<16x32xbf16>, vector<32x64xbf16>, vector<16x64xf32> -> vector<16x64xf32>
    %c0_45 = arith.constant 0 : index
    %c0_46 = arith.constant 0 : index
    %92 = vector.load %arg13[%c0_45, %c0_46] : memref<1x64xf32, #tpu.memory_space<vmem>>, vector<1x64xf32>
    %93 = vector.broadcast %92 : vector<1x64xf32> to vector<16x64xf32>
    %94 = arith.addf %91, %93 : vector<16x64xf32>
    %95 = arith.mulf %94, %94 : vector<16x64xf32>
    %96 = arith.mulf %94, %95 : vector<16x64xf32>
    %cst_47 = arith.constant 4.471500e-02 : f32
    %97 = vector.broadcast %cst_47 : f32 to vector<16x64xf32>
    %98 = arith.mulf %97, %96 : vector<16x64xf32>
    %99 = arith.addf %94, %98 : vector<16x64xf32>
    %cst_48 = arith.constant 0.797884583 : f32
    %100 = vector.broadcast %cst_48 : f32 to vector<16x64xf32>
    %101 = arith.mulf %100, %99 : vector<16x64xf32>
    %102 = math.tanh %101 : vector<16x64xf32>
    %cst_49 = arith.constant 1.000000e+00 : f32
    %103 = vector.broadcast %cst_49 : f32 to vector<16x64xf32>
    %104 = arith.addf %103, %102 : vector<16x64xf32>
    %cst_50 = arith.constant 5.000000e-01 : f32
    %105 = vector.broadcast %cst_50 : f32 to vector<16x64xf32>
    %106 = arith.mulf %105, %104 : vector<16x64xf32>
    %107 = arith.mulf %94, %106 : vector<16x64xf32>
    %108 = arith.truncf %107 : vector<16x64xf32> to vector<16x64xbf16>
    %c0_51 = arith.constant 0 : index
    %c0_52 = arith.constant 0 : index
    %109 = vector.load %arg14[%c0_51, %c0_52] : memref<64x32xbf16, #tpu.memory_space<vmem>>, vector<64x32xbf16>
    %cst_53 = arith.constant dense<0.000000e+00> : vector<16x32xf32>
    %110 = tpu.matmul %108, %109, %cst_53 {dimension_numbers = #tpu.dot_dimension_numbers<[1], [0], [0], [1], [0, 0, 1, 1], [], []>} : vector<16x64xbf16>, vector<64x32xbf16>, vector<16x32xf32> -> vector<16x32xf32>
    %c0_54 = arith.constant 0 : index
    %c0_55 = arith.constant 0 : index
    %111 = vector.load %arg15[%c0_54, %c0_55] : memref<1x32xf32, #tpu.memory_space<vmem>>, vector<1x32xf32>
    %112 = vector.broadcast %111 : vector<1x32xf32> to vector<16x32xf32>
    %113 = arith.addf %110, %112 : vector<16x32xf32>
    %114 = arith.addf %64, %113 : vector<16x32xf32>
    %c0_56 = arith.constant 0 : index
    %c0_57 = arith.constant 0 : index
    %115 = vector.load %arg16[%c0_56, %c0_57] : memref<1x32xf32, #tpu.memory_space<vmem>>, vector<1x32xf32>
    %c0_58 = arith.constant 0 : index
    %c0_59 = arith.constant 0 : index
    %116 = vector.load %arg17[%c0_58, %c0_59] : memref<1x32xf32, #tpu.memory_space<vmem>>, vector<1x32xf32>
    %cst_60 = arith.constant dense<0.000000e+00> : vector<16xf32>
    %117 = vector.multi_reduction <add>, %114, %cst_60 [1] : vector<16x32xf32> to vector<16xf32>
    %118 = vector.shape_cast %117 : vector<16xf32> to vector<16x1xf32>
    %cst_61 = arith.constant 3.200000e+01 : f32
    %119 = vector.broadcast %cst_61 : f32 to vector<16x1xf32>
    %120 = arith.divf %118, %119 : vector<16x1xf32>
    %121 = vector.broadcast %120 : vector<16x1xf32> to vector<16x32xf32>
    %122 = arith.subf %114, %121 : vector<16x32xf32>
    %123 = arith.mulf %122, %122 : vector<16x32xf32>
    %cst_62 = arith.constant dense<0.000000e+00> : vector<16xf32>
    %124 = vector.multi_reduction <add>, %123, %cst_62 [1] : vector<16x32xf32> to vector<16xf32>
    %125 = vector.shape_cast %124 : vector<16xf32> to vector<16x1xf32>
    %cst_63 = arith.constant 3.200000e+01 : f32
    %126 = vector.broadcast %cst_63 : f32 to vector<16x1xf32>
    %127 = arith.divf %125, %126 : vector<16x1xf32>
    %128 = vector.broadcast %120 : vector<16x1xf32> to vector<16x32xf32>
    %129 = arith.subf %114, %128 : vector<16x32xf32>
    %cst_64 = arith.constant 9.99999974E-6 : f32
    %130 = vector.broadcast %cst_64 : f32 to vector<16x1xf32>
    %131 = arith.addf %127, %130 : vector<16x1xf32>
    %132 = math.rsqrt %131 : vector<16x1xf32>
    %133 = vector.broadcast %132 : vector<16x1xf32> to vector<16x32xf32>
    %134 = arith.mulf %129, %133 : vector<16x32xf32>
    %135 = vector.broadcast %115 : vector<1x32xf32> to vector<16x32xf32>
    %136 = arith.mulf %134, %135 : vector<16x32xf32>
    %137 = vector.broadcast %116 : vector<1x32xf32> to vector<16x32xf32>
    %138 = arith.addf %136, %137 : vector<16x32xf32>
    %139 = vector.shape_cast %138 : vector<16x32xf32> to vector<1x16x32xf32>
    %cst_65 = arith.constant dense<0.000000e+00> : vector<1x32xf32>
    %140 = vector.multi_reduction <add>, %139, %cst_65 [1] : vector<1x16x32xf32> to vector<1x32xf32>
    %cst_66 = arith.constant 1.600000e+01 : f32
    %141 = vector.broadcast %cst_66 : f32 to vector<1x32xf32>
    %142 = arith.divf %140, %141 : vector<1x32xf32>
    %143 = arith.truncf %142 : vector<1x32xf32> to vector<1x32xbf16>
    %c0_67 = arith.constant 0 : index
    %c0_68 = arith.constant 0 : index
    %144 = vector.load %arg18[%c0_67, %c0_68] : memref<32x128xbf16, #tpu.memory_space<vmem>>, vector<32x128xbf16>
    %cst_69 = arith.constant dense<0.000000e+00> : vector<1x128xf32>
    %145 = tpu.matmul %143, %144, %cst_69 {dimension_numbers = #tpu.dot_dimension_numbers<[1], [0], [0], [1], [0, 0, 1, 1], [], []>} : vector<1x32xbf16>, vector<32x128xbf16>, vector<1x128xf32> -> vector<1x128xf32>
    %c0_70 = arith.constant 0 : index
    %c0_71 = arith.constant 0 : index
    %146 = vector.load %arg19[%c0_70, %c0_71] : memref<1x128xf32, #tpu.memory_space<vmem>>, vector<1x128xf32>
    %147 = arith.addf %145, %146 : vector<1x128xf32>
    %cst_72 = arith.constant 0.000000e+00 : f32
    %148 = vector.broadcast %cst_72 : f32 to vector<8x128xf32>
    %c0_73 = arith.constant 0 : index
    %c0_74 = arith.constant 0 : index
    %c0_75 = arith.constant 0 : index
    %149 = vector.load %arg20[%c0_73, %c0_74, %c0_75] : memref<1x8x128xf32, #tpu.memory_space<vmem>>, vector<1x8x128xf32>
    %150 = vector.shape_cast %149 : vector<1x8x128xf32> to vector<8x128xf32>
    %151 = vector.shape_cast %148 : vector<8x128xf32> to vector<1x8x128xf32>
    tpu.vector_store %arg20[%c0_73, %c0_74, %c0_75], %151 {strides = array<i32>} : memref<1x8x128xf32, #tpu.memory_space<vmem>>, vector<1x8x128xf32>,
    %c0_76 = arith.constant 0 : index
    %c0_77 = arith.constant 0 : index
    %c0_78 = arith.constant 0 : index
    %152 = vector.load %arg20[%c0_76, %c0_77, %c0_78] : memref<1x8x128xf32, #tpu.memory_space<vmem>>, vector<1x1x128xf32>
    %153 = vector.shape_cast %152 : vector<1x1x128xf32> to vector<1x128xf32>
    %154 = vector.shape_cast %147 : vector<1x128xf32> to vector<1x1x128xf32>
    tpu.vector_store %arg20[%c0_76, %c0_77, %c0_78], %154 {strides = array<i32>} : memref<1x8x128xf32, #tpu.memory_space<vmem>>, vector<1x1x128xf32>,
    return
  }
  func.func @transform_0(%arg0: i32) -> (i32, i32, i32) {
    %c0_i32 = arith.constant 0 : i32
    %c0_i32_0 = arith.constant 0 : i32
    %c0_i32_1 = arith.constant 0 : i32
    return %arg0, %c0_i32, %c0_i32_0 : i32, i32, i32
  }
  func.func @transform_1(%arg0: i32) -> (i32, i32) {
    %c0_i32 = arith.constant 0 : i32
    %c0_i32_0 = arith.constant 0 : i32
    %c0_i32_1 = arith.constant 0 : i32
    return %c0_i32, %c0_i32_0 : i32, i32
  }
  func.func @transform_2(%arg0: i32) -> (i32, i32) {
    %c0_i32 = arith.constant 0 : i32
    %c0_i32_0 = arith.constant 0 : i32
    %c0_i32_1 = arith.constant 0 : i32
    return %c0_i32, %c0_i32_0 : i32, i32
  }
  func.func @transform_3(%arg0: i32) -> (i32, i32) {
    %c0_i32 = arith.constant 0 : i32
    %c0_i32_0 = arith.constant 0 : i32
    %c0_i32_1 = arith.constant 0 : i32
    return %c0_i32, %c0_i32_0 : i32, i32
  }
  func.func @transform_4(%arg0: i32) -> (i32, i32) {
    %c0_i32 = arith.constant 0 : i32
    %c0_i32_0 = arith.constant 0 : i32
    %c0_i32_1 = arith.constant 0 : i32
    return %c0_i32, %c0_i32_0 : i32, i32
  }
  func.func @transform_5(%arg0: i32) -> (i32, i32) {
    %c0_i32 = arith.constant 0 : i32
    %c0_i32_0 = arith.constant 0 : i32
    %c0_i32_1 = arith.constant 0 : i32
    return %c0_i32, %c0_i32_0 : i32, i32
  }
  func.func @transform_6(%arg0: i32) -> (i32, i32) {
    %c0_i32 = arith.constant 0 : i32
    %c0_i32_0 = arith.constant 0 : i32
    %c0_i32_1 = arith.constant 0 : i32
    return %c0_i32, %c0_i32_0 : i32, i32
  }
  func.func @transform_7(%arg0: i32) -> (i32, i32) {
    %c0_i32 = arith.constant 0 : i32
    %c0_i32_0 = arith.constant 0 : i32
    %c0_i32_1 = arith.constant 0 : i32
    return %c0_i32, %c0_i32_0 : i32, i32
  }
  func.func @transform_8(%arg0: i32) -> (i32, i32) {
    %c0_i32 = arith.constant 0 : i32
    %c0_i32_0 = arith.constant 0 : i32
    %c0_i32_1 = arith.constant 0 : i32
    return %c0_i32, %c0_i32_0 : i32, i32
  }
  func.func @transform_9(%arg0: i32) -> (i32, i32) {
    %c0_i32 = arith.constant 0 : i32
    %c0_i32_0 = arith.constant 0 : i32
    %c0_i32_1 = arith.constant 0 : i32
    return %c0_i32, %c0_i32_0 : i32, i32
  }
  func.func @transform_10(%arg0: i32) -> (i32, i32) {
    %c0_i32 = arith.constant 0 : i32
    %c0_i32_0 = arith.constant 0 : i32
    %c0_i32_1 = arith.constant 0 : i32
    return %c0_i32, %c0_i32_0 : i32, i32
  }
  func.func @transform_11(%arg0: i32) -> (i32, i32) {
    %c0_i32 = arith.constant 0 : i32
    %c0_i32_0 = arith.constant 0 : i32
    %c0_i32_1 = arith.constant 0 : i32
    return %c0_i32, %c0_i32_0 : i32, i32
  }
  func.func @transform_12(%arg0: i32) -> (i32, i32) {
    %c0_i32 = arith.constant 0 : i32
    %c0_i32_0 = arith.constant 0 : i32
    %c0_i32_1 = arith.constant 0 : i32
    return %c0_i32, %c0_i32_0 : i32, i32
  }
  func.func @transform_13(%arg0: i32) -> (i32, i32) {
    %c0_i32 = arith.constant 0 : i32
    %c0_i32_0 = arith.constant 0 : i32
    %c0_i32_1 = arith.constant 0 : i32
    return %c0_i32, %c0_i32_0 : i32, i32
  }
  func.func @transform_14(%arg0: i32) -> (i32, i32) {
    %c0_i32 = arith.constant 0 : i32
    %c0_i32_0 = arith.constant 0 : i32
    %c0_i32_1 = arith.constant 0 : i32
    return %c0_i32, %c0_i32_0 : i32, i32
  }
  func.func @transform_15(%arg0: i32) -> (i32, i32) {
    %c0_i32 = arith.constant 0 : i32
    %c0_i32_0 = arith.constant 0 : i32
    %c0_i32_1 = arith.constant 0 : i32
    return %c0_i32, %c0_i32_0 : i32, i32
  }
  func.func @transform_16(%arg0: i32) -> (i32, i32) {
    %c0_i32 = arith.constant 0 : i32
    %c0_i32_0 = arith.constant 0 : i32
    %c0_i32_1 = arith.constant 0 : i32
    return %c0_i32, %c0_i32_0 : i32, i32
  }
  func.func @transform_17(%arg0: i32) -> (i32, i32) {
    %c0_i32 = arith.constant 0 : i32
    %c0_i32_0 = arith.constant 0 : i32
    %c0_i32_1 = arith.constant 0 : i32
    return %c0_i32, %c0_i32_0 : i32, i32
  }
  func.func @transform_18(%arg0: i32) -> (i32, i32) {
    %c0_i32 = arith.constant 0 : i32
    %c0_i32_0 = arith.constant 0 : i32
    %c0_i32_1 = arith.constant 0 : i32
    return %c0_i32, %c0_i32_0 : i32, i32
  }
  func.func @transform_19(%arg0: i32) -> (i32, i32, i32) {
    %c0_i32 = arith.constant 0 : i32
    %c0_i32_0 = arith.constant 0 : i32
    %c0_i32_1 = arith.constant 0 : i32
    return %arg0, %c0_i32, %c0_i32_0 : i32, i32, i32
  }
}

</mosaic_0001>

<bundles_post_ra>
// kernel: triplet_forward.1
= control target key start
LH: loop header
LB: loop body
LE: loop exit
PB: predicated region body
PF: predicated region fallthrough
CT: control target
= control target key end

     0   :  { %s2010_s0 = inlined_call_operand.vmem [shape: bf16[2,16,48], index: 0, kind: input, shape index: {}]   ;;  %s2011_s1 = inlined_call_operand.vmem [shape: bf16[48,32], index: 1, kind: input, shape index: {}]   ;;  %s2012_s2 = inlined_call_operand.vmem [shape: f32[1,32], index: 2, kind: input, shape index: {}]   ;;  %s2013_s3 = inlined_call_operand.vmem [shape: f32[1,32], index: 3, kind: input, shape index: {}]   ;;  %s2014_s4 = inlined_call_operand.vmem [shape: f32[1,32], index: 4, kind: input, shape index: {}]   ;;  %s2015_s5 = inlined_call_operand.vmem [shape: bf16[32,32], index: 5, kind: input, shape index: {}]   ;;  %s2016_s6 = inlined_call_operand.vmem [shape: bf16[32,32], index: 6, kind: input, shape index: {}]   ;;  %s2017_s7 = inlined_call_operand.vmem [shape: bf16[32,32], index: 7, kind: input, shape index: {}]   ;;  %s2018_s8 = inlined_call_operand.vmem [shape: bf16[32,32], index: 8, kind: input, shape index: {}]   ;;  %s2019_s9 = inlined_call_operand.vmem [shape: f32[1,32], index: 9, kind: input, shape index: {}]   ;;  %s2020_s10 = inlined_call_operand.vmem [shape: f32[1,32], index: 10, kind: input, shape index: {}]   ;;  %s2021_s11 = inlined_call_operand.vmem [shape: bf16[32,64], index: 11, kind: input, shape index: {}]   ;;  %s2022_s12 = inlined_call_operand.vmem [shape: f32[1,64], index: 12, kind: input, shape index: {}]   ;;  %s2023_s13 = inlined_call_operand.vmem [shape: bf16[64,32], index: 13, kind: input, shape index: {}]   ;;  %s2024_s14 = inlined_call_operand.vmem [shape: f32[1,32], index: 14, kind: input, shape index: {}]   ;;  %s2025_s15 = inlined_call_operand.vmem [shape: f32[1,32], index: 15, kind: input, shape index: {}]   ;;  %s2026_s16 = inlined_call_operand.vmem [shape: f32[1,32], index: 16, kind: input, shape index: {}]   ;;  %s2027_s17 = inlined_call_operand.vmem [shape: bf16[32,128], index: 17, kind: input, shape index: {}]   ;;  %s2028_s18 = inlined_call_operand.vmem [shape: f32[1,128], index: 18, kind: input, shape index: {}]   ;;  %s2029_s19 = inlined_call_operand.vmem [shape: f32[2,8,128], index: 19, kind: output, shape index: {}]  }
   0x1   :  { %2031 = sst [smem:[#allocation2_spill]] %s2010_s0  ;;  %s1806_s0 = smov 0  }
   0x2   :  { %2032 = sst [smem:[#allocation3_spill]] %s2011_s1 }
   0x3   :  { %2033 = sst [smem:[#allocation4_spill]] %s2012_s2 }
   0x4   :  { %2034 = sst [smem:[#allocation5_spill]] %s2013_s3 }
   0x5 LB: > { %s1479_s30 = sadd.s32 4294967295, %s1702_s0   ;;  %p1483_p0 = scmp.ge.s32.totalorder %s1702_s0, 1  ;;  %s1702_s0 = sphi %s1806_s0, %s29_s0  }
   0x6   : > { %p537_p1 = scmp.lt.s32.totalorder %s1702_s0, 3 }
   0x8   : > { %p538_p2 = pnand %p1483_p0, %p537_p1 }
   0x9   : > { %s2035_s1 = sld [smem:[#allocation3_spill]] (!%p538_p2)  ;;  %v1704_v1 = vmov (!%p538_p2), 0.0   ;;  %vm1705_vm0 = vmmov (!%p538_p2), 0   ;;  %p592_p3 = scmp.lt.s32.totalorder (!%p538_p2), %s1479_s30, 1  ;;  %vm640_vm1 = vcmask (!%p538_p2), 392192   ;;  %vm687_vm2 = vcmask (!%p538_p2), 261120  }
   0xa   : > { %541 = sbr.rel (%p538_p2) target bundleno = 3079 (0xc07), region = 96  ;;  %1560 = vmatprep.subr.bf16.mxu0 (!%p538_p2), %v1704_v1  ;;  %1570 = vmatprep.subr.bf16.mxu1 (!%p538_p2), %v1704_v1  ;;  %s2036_s27 = sld [smem:[#allocation2_spill]] (!%p538_p2)  ;;  %v1656_v24 = vld [vmem:[%s2015_s5] sm:$0xff] (!%p538_p2)   ;;  %v1658_v26 = vld [vmem:[%s2015_s5 + $0x8] sm:$0xff] (!%p538_p2)   ;;  %vm958_vm3 = vcmask (!%p538_p2), 130048   ;;  %vm1261_vm4 = vcmask (!%p538_p2), 523264  }
   0xb   : > { %1566 = vmatprep.mubr.msk.bf16.mxu0 (!%p538_p2), %vm1705_vm0, %v1704_v1  ;;  %1574 = vmatprep.mubr.msk.bf16.mxu1 (!%p538_p2), %vm1705_vm0, %v1704_v1  ;;  %s2037_s21 = sld [smem:[#allocation4_spill]] (!%p538_p2)  ;;  %v1657_v25 = vld [vmem:[%s2017_s7] sm:$0xff] (!%p538_p2)   ;;  %v1659_v27 = vld [vmem:[%s2017_s7 + $0x8] sm:$0xff] (!%p538_p2)  }
   0xc   : > { %1571 = vmatpush3.bf16.msra.mxu1 (!%p538_p2), %v1656_v24  ;;  %v1494_v40 = vld [vmem:[%s2014_s4] ss:$0 sm:$0xff] (!%p538_p2)  ;;  %v1661_v46 = vld [vmem:[%s2016_s6 + $0x8] sm:$0xff] (!%p538_p2)  }
   0xd   : > { %1572 = vmatprep.subr.bf16.mxu1 (!%p538_p2), %v1704_v1  ;;  %v1660_v44 = vld [vmem:[%s2016_s6] sm:$0xff] (!%p538_p2)  }
   0xf   : > { %v1652_v0 = vld [vmem:[%s2035_s1] sm:$0xff] (!%p538_p2)   ;;  %v1653_v2 = vld [vmem:[%s2035_s1 + $0x8] sm:$0xff] (!%p538_p2)   ;;  %v1654_v3 = vld [vmem:[%s2035_s1 + $0x10] sm:$0xff] (!%p538_p2)  }
  0x10   : > { %1561 = vmatpush3.bf16.msra.mxu0 (!%p538_p2), %v1652_v0  ;;  %1573 = vmatpush3.bf16.msra.mxu1 (!%p538_p2), %v1658_v26 }
  0x11   : > { %1562 = vmatprep.subr.bf16.mxu0 %v1704_v1  ;;  %s2040_s30 = smov (!%p592_p3, %s1479_s30), 1  ;;  %v1487_v5 = vld [vmem:[%s2037_s21] ss:$0 sm:$0xff]  ;;  %1578 = vmatprep.subr.bf16.mxu1 %v1704_v1  ;;  %s2038_s21 = sld [smem:[#allocation5_spill]] }
  0x12   : > { %s1528_s25 = sshll.u32 %s2040_s30, 3 }
  0x13   : > { %s596_s28 = scalar_lea.vmem %s2036_s27, %s1528_s25  ;;  %s1990_s24 = scalar_lea.vmem %s2029_s19, %s1528_s25 }
  0x14   : > { %1563 = vmatpush3.bf16.msra.mxu0 %v1653_v2  ;;  %v1655_v4 = vld [vmem:[%s596_s28] sm:$0xff]   ;;  %1424 = vst [vmem:[%s1990_s24] sm:$0xff] %v1704_v1 }
  0x15   : > { %1564 = vmatprep.subr.bf16.mxu0 %v1704_v1 }
  0x17   : > { %v1493_v36 = vld [vmem:[%s2038_s21] ss:$0 sm:$0xff] }
  0x18   : > { %1565 = vmatpush3.bf16.msra.mxu0 %v1654_v3 }
  0x19   : > { %1586 = vmatprep.subr.bf16.mxu0 %v1704_v1 }
  0x1b   : > { %1567 = vmatmul.mubr.msk.bf16.vlgmr.msra.gmra.mrb[0].mxu0 %vm640_vm1, %v1655_v4 }
  0x1c   : > { %1590 = vmatprep.mubr.msk.bf16.mxu0 %vm1705_vm0, %v1704_v1  ;;  %1587 = vmatpush3.bf16.msra.mxu0 %v1657_v25 }
  0x1d   : > { %1588 = vmatprep.subr.bf16.mxu0 %v1704_v1 }
  0x20   : > { %1589 = vmatpush3.bf16.msra.mxu0 %v1659_v27 }
  0x21   : > { %1600 = vmatprep.subr.bf16.mxu0 %v1704_v1 }
  0xee   : > { %v678_v6 = vpop.f32.mrb[0].mxu0 }
  0xef   : > { %v1845_v7 = vadd.f32 %v1487_v5, %v678_v6  ;;  %v1568_v8 = vpop.f32.mrb[1].mxu0 }
  0xf0   : > { %v681_v9 = vpop.f32.mrb[2].mxu0 }
  0xf1   : > { %v1847_v10 = vadd.f32 %v1487_v5, %v681_v9  ;;  %v1569_v11 = vpop.f32.mrb[3].mxu0  ;;  %v688_v12 = vsel %vm687_vm2, %v1845_v7, 0.0 }
  0xf2   : > { %689 = vadd.xlane.f32.xlu0 %v688_v12 }
  0xf3   : > { %v691_v13 = vsel %vm687_vm2, %v1847_v10, 0.0 }
  0xf6   : > { %692 = vadd.xlane.f32.xlu0 %v691_v13 }
 0x17f   : > { %v690_v14 = vpop.xlane.xlu0 %689 }
 0x180   : > { %v695_v15 = vmul.f32 0.03125, %v690_v14 }
 0x182   : > { %v697_v16 = vsub.f32 %v1845_v7, %v695_v15 }
 0x183   : > { %v693_v17 = vpop.xlane.xlu0 %692 }
 0x184   : > { %v696_v18 = vmul.f32 0.03125, %v693_v17  ;;  %v699_v19 = vmul.f32 %v697_v16, %v697_v16 }
 0x186   : > { %v698_v20 = vsub.f32 %v1847_v10, %v696_v18  ;;  %v701_v21 = vsel %vm687_vm2, %v699_v19, 0.0 }
 0x187   : > { %702 = vadd.xlane.f32.xlu1 %v701_v21 }
 0x188   : > { %v700_v22 = vmul.f32 %v698_v20, %v698_v20 }
 0x18a   : > { %v704_v23 = vsel %vm687_vm2, %v700_v22, 0.0 }
 0x18b   : > { %705 = vadd.xlane.f32.xlu1 %v704_v23 }
 0x214   : > { %v703_v28 = vpop.xlane.xlu1 %702 }
 0x215   : > { %v707_v29 = vmul.f32 0.03125, %v703_v28  ;;  %v1663_v28 = vld [vmem:[%s2018_s8 + $0x8] sm:$0xff]  }
 0x217   : > { %v709_v30 = vadd.f32 1e-05, %v707_v29 }
 0x218   : > { %v706_v31 = vpop.xlane.xlu1 %705 }
 0x219   : > { %1672 = vrsqrt.f32 %v709_v30  ;;  %v708_v32 = vmul.f32 0.03125, %v706_v31 }
 0x21b   : > { %v710_v33 = vadd.f32 1e-05, %v708_v32 }
 0x21d   : > { %1674 = vrsqrt.f32 %v710_v33 }
 0x223   : > { %v1673_v34 = vpop.eup %1672 }
 0x224   : > { %v713_v35 = vmul.f32 %v1673_v34, %v697_v16 }
 0x226   : > { %v721_v39 = vmul.f32 %v1493_v36, %v713_v35 }
 0x227   : > { %v1675_v37 = vpop.eup %1674 }
 0x228   : > { %v714_v38 = vmul.f32 %v1675_v37, %v698_v20  ;;  %v729_v42 = vadd.f32 %v1494_v40, %v721_v39  ;;  %v1662_v20 = vld [vmem:[%s2018_s8] sm:$0xff]  }
 0x22a   : > { %v722_v41 = vmul.f32 %v1493_v36, %v714_v38 }
 0x22c   : > { %v730_v43 = vadd.f32 %v1494_v40, %v722_v41 }
 0x22e   : > { %v731_v45 = vpack.c.bf16 %v730_v43, %v729_v42 }
 0x230   : > { %1575 = vmatmul.mubr.msk.bf16.vlgmr.msra.gmra.mrb[0].mxu1 %vm687_vm2, %v731_v45  ;;  %1591 = vmatmul.mubr.msk.bf16.vlgmr.msra.gmra.mrb[4].mxu0 %vm687_vm2, %v731_v45 }
 0x231   : > { %1579 = vmatpush3.bf16.msra.mxu1 %v1660_v44  ;;  %1582 = vmatprep.mubr.msk.bf16.mxu1 %vm1705_vm0, %v1704_v1 }
 0x232   : > { %1580 = vmatprep.subr.bf16.mxu1 %v1704_v1  ;;  %1602 = vmatprep.mubr.msk.bf16.mxu0 %vm1705_vm0, %v1704_v1 }
 0x235   : > { %1581 = vmatpush3.bf16.msra.mxu1 %v1661_v46 }
 0x236   : > { %1594 = vmatprep.subr.bf16.mxu1 %v1704_v1 }
 0x238   : > { %1583 = vmatmul.mubr.msk.bf16.vlgmr.msra.gmra.mrb[4].mxu1 %vm687_vm2, %v731_v45 }
 0x239   : > { %1596 = vmatprep.mubr.msk.bf16.mxu1 %vm1705_vm0, %v1704_v1 }
 0x303   : > { %v785_v47 = vpop.f32.mrb[0].mxu1  ;;  %v899_v48 = vpop.f32.mrb[4].mxu0 }
 0x304   : > { %v1576_v49 = vpop.f32.mrb[1].mxu1  ;;  %v1592_v50 = vpop.f32.mrb[5].mxu0  ;;  %v906_v53 = vmul.f32 0.17677669, %v785_v47 }
 0x305   : > { %v788_v51 = vpop.f32.mrb[2].mxu1  ;;  %v902_v52 = vpop.f32.mrb[6].mxu0  ;;  %v1664_v50 = vld [vmem:[%s2021_s11] sm:$0xff]  }
 0x306   : > { %v907_v54 = vmul.f32 0.17677669, %v788_v51  ;;  %v910_v55 = vpack.c.bf16 %v902_v52, %v899_v48  ;;  %v1577_v56 = vpop.f32.mrb[3].mxu1  ;;  %v1593_v57 = vpop.f32.mrb[7].mxu0  ;;  %v1665_v51 = vld [vmem:[%s2021_s11 + $0x8] sm:$0xff]  }
 0x308   : > { %v908_v58 = vpack.c.bf16 %v907_v54, %v906_v53  ;;  %1601 = vmatpush3.bf16.msra.mxu0 %v910_v55 }
 0x309   : > { %1614 = vmatprep.subr.bf16.mxu0 %v1704_v1 }
 0x30b   : > { %v842_v59 = vpop.f32.mrb[4].mxu1 }
 0x30c   : > { %v1584_v60 = vpop.f32.mrb[5].mxu1 }
 0x30d   : > { %v845_v61 = vpop.f32.mrb[6].mxu1 }
 0x30e   : > { %v909_v62 = vpack.c.bf16 %v845_v61, %v842_v59  ;;  %v1585_v63 = vpop.f32.mrb[7].mxu1  ;;  %v1509_v59 = vld [vmem:[%s2019_s9] ss:$0 sm:$0xff] }
 0x310   : > { %v915_v0 = vsel %vm687_vm2, %v909_v62, 0 }
 0x311   : > { %1595 = vmatpush3.bf16.xpose.msra.mxu1 %v915_v0  ;;  %v1510_v0 = vld [vmem:[%s2020_s10] ss:$0 sm:$0xff] }
 0x312   : > { %1606 = vmatprep.subr.bf16.mxu1 %v1704_v1 }
 0x318   : > { %1597 = vmatmul.mubr.msk.bf16.vlgmr.msra.gmra.mrb[8].mxu1 %vm687_vm2, %v908_v58 }
 0x319   : > { %1610 = vmatprep.mubr.msk.bf16.mxu1 %vm1705_vm0, %v1704_v1  ;;  %1607 = vmatpush3.bf16.msra.mxu1 %v1662_v20 }
 0x31a   : > { %1608 = vmatprep.subr.bf16.mxu1 %v1704_v1 }
 0x31d   : > { %1609 = vmatpush3.bf16.msra.mxu1 %v1663_v28 }
 0x31e   : > { %1622 = vmatprep.subr.bf16.mxu1 %v1704_v1 }
 0x3eb   : > { %v951_v2 = vpop.f32.mrb[8].mxu1 }
 0x3ec   : > { %v1598_v3 = vpop.f32.mrb[9].mxu1  ;;  %v959_v4 = vsel %vm958_vm3, %v951_v2, -inf }
 0x3ed   : > { %960 = vmax.xlane.f32.xlu0 %v959_v4  ;;  %v954_v5 = vpop.f32.mrb[10].mxu1 }
 0x3ee   : > { %v1599_v6 = vpop.f32.mrb[11].mxu1  ;;  %v962_v8 = vsel %vm958_vm3, %v954_v5, -inf }
 0x3ef   : > { %963 = vmax.xlane.f32.xlu1 %v962_v8  ;;  %v1666_v6 = vld [vmem:[%s2023_s13] sm:$0xff]   ;;  %v1667_v8 = vld [vmem:[%s2023_s13 + $0x8] sm:$0xff]  }
 0x47a   : > { %v961_v9 = vpop.xlane.xlu0 %960 }
 0x47b   : > { %v965_v11 = vsub.f32 %v951_v2, %v961_v9  ;;  %v1668_v9 = vld [vmem:[%s2023_s13 + $0x10] sm:$0xff]  }
 0x47c   : > { %v964_v12 = vpop.xlane.xlu1 %963 }
 0x47d   : > { %v967_v13 = vmul.f32 1.442695, %v965_v11  ;;  %v966_v14 = vsub.f32 %v954_v5, %v964_v12  ;;  %v1669_v11 = vld [vmem:[%s2023_s13 + $0x18] sm:$0xff]   ;;  %v1511_v12 = vld [vmem:[%s2022_s12] ss:$0 sm:$0xff] }
 0x47f   : > { %1676 = vpow2.f32 %v967_v13  ;;  %v969_v15 = vmul.f32 1.442695, %v966_v14 }
 0x481   : > { %1678 = vpow2.f32 %v969_v15 }
 0x489   : > { %v1677_v16 = vpop.eup %1676 }
 0x48a   : > { %v971_v17 = vsel %vm958_vm3, %v1677_v16, 0.0 }
 0x48b   : > { %v1679_v18 = vpop.eup %1678  ;;  %972 = vadd.xlane.f32.xlu0 %v971_v17 }
 0x48c   : > { %v974_v19 = vsel %vm958_vm3, %v1679_v18, 0.0 }
 0x48d   : > { %975 = vadd.xlane.f32.xlu1 %v974_v19 }
 0x518   : > { %v973_v21 = vpop.xlane.xlu0 %972 }
 0x519   : > { %1680 = vrcp.f32 %v973_v21 }
 0x51a   : > { %v976_v22 = vpop.xlane.xlu1 %975 }
 0x51b   : > { %1682 = vrcp.f32 %v976_v22 }
 0x523   : > { %v1681_v23 = vpop.eup %1680 }
 0x524   : > { %v981_v25 = vmul.f32 %v1681_v23, %v1677_v16 }
 0x525   : > { %v1683_v24 = vpop.eup %1682 }
 0x526   : > { %v982_v26 = vmul.f32 %v1683_v24, %v1679_v18 }
 0x528   : > { %v983_v27 = vpack.c.bf16 %v982_v26, %v981_v25 }
 0x52a   : > { %1603 = vmatmul.mubr.msk.bf16.vlgmr.msra.gmra.mrb[8].mxu0 %vm958_vm3, %v983_v27 }
 0x52b   : > { %1618 = vmatprep.mubr.msk.bf16.mxu0 %vm1705_vm0, %v1704_v1  ;;  %1615 = vmatpush3.bf16.msra.mxu0 %v1664_v50 }
 0x52c   : > { %1616 = vmatprep.subr.bf16.mxu0 %v1704_v1 }
 0x52f   : > { %1617 = vmatpush3.bf16.msra.mxu0 %v1665_v51 }
 0x530   : > { %1634 = vmatprep.subr.bf16.mxu0 %v1704_v1 }
 0x5fd   : > { %v1021_v29 = vpop.f32.mrb[8].mxu0 }
 0x5fe   : > { %v1604_v30 = vpop.f32.mrb[9].mxu0 }
 0x5ff   : > { %v1024_v31 = vpop.f32.mrb[10].mxu0 }
 0x600   : > { %v1028_v32 = vpack.c.bf16 %v1024_v31, %v1021_v29  ;;  %v1605_v33 = vpop.f32.mrb[11].mxu0 }
 0x602   : > { %1611 = vmatmul.mubr.msk.bf16.vlgmr.msra.gmra.mrb[12].mxu1 %vm687_vm2, %v1028_v32 }
 0x603   : > { %1630 = vmatprep.mubr.msk.bf16.mxu1 %vm1705_vm0, %v1704_v1  ;;  %1623 = vmatpush3.bf16.msra.mxu1 %v1666_v6  ;;  %v1522_v6 = vld [vmem:[%s2026_s16] ss:$0 sm:$0xff] }
 0x604   : > { %1624 = vmatprep.subr.bf16.mxu1 %v1704_v1 }
 0x607   : > { %1625 = vmatpush3.bf16.msra.mxu1 %v1667_v8 }
 0x608   : > { %1626 = vmatprep.subr.bf16.mxu1 %v1704_v1 }
 0x60b   : > { %1627 = vmatpush3.bf16.msra.mxu1 %v1668_v9 }
 0x60c   : > { %1628 = vmatprep.subr.bf16.mxu1 %v1704_v1 }
 0x60f   : > { %1629 = vmatpush3.bf16.msra.mxu1 %v1669_v11 }
 0x6d5   : > { %v1082_v34 = vpop.f32.mrb[12].mxu1 }
 0x6d6   : > { %v1921_v35 = vadd.f32 %v1082_v34, %v1845_v7  ;;  %v1612_v36 = vpop.f32.mrb[13].mxu1 }
 0x6d7   : > { %v1085_v37 = vpop.f32.mrb[14].mxu1 }
 0x6d8   : > { %v1924_v38 = vadd.f32 %v1085_v37, %v1847_v10  ;;  %v1613_v39 = vpop.f32.mrb[15].mxu1  ;;  %v1093_v40 = vsel %vm687_vm2, %v1921_v35, 0.0 }
 0x6d9   : > { %1094 = vadd.xlane.f32.xlu0 %v1093_v40  ;;  %v1515_v40 = vld [vmem:[%s2024_s14] ss:$0 sm:$0xff] }
 0x6da   : > { %v1096_v41 = vsel %vm687_vm2, %v1924_v38, 0.0 }
 0x6db   : > { %1097 = vadd.xlane.f32.xlu1 %v1096_v41 }
 0x766   : > { %v1095_v42 = vpop.xlane.xlu0 %1094 }
 0x767   : > { %v1099_v43 = vmul.f32 0.03125, %v1095_v42 }
 0x768   : > { %v1098_v44 = vpop.xlane.xlu1 %1097 }
 0x769   : > { %v1101_v7 = vsub.f32 %v1921_v35, %v1099_v43  ;;  %v1100_v45 = vmul.f32 0.03125, %v1098_v44 }
 0x76b   : > { %v1102_v46 = vsub.f32 %v1924_v38, %v1100_v45  ;;  %v1103_v47 = vmul.f32 %v1101_v7, %v1101_v7 }
 0x76d   : > { %v1105_v10 = vsel %vm687_vm2, %v1103_v47, 0.0  ;;  %v1104_v48 = vmul.f32 %v1102_v46, %v1102_v46 }
 0x76e   : > { %1106 = vadd.xlane.f32.xlu0 %v1105_v10 }
 0x76f   : > { %v1108_v49 = vsel %vm687_vm2, %v1104_v48, 0.0 }
 0x770   : > { %1109 = vadd.xlane.f32.xlu1 %v1108_v49 }
 0x7fb   : > { %v1107_v52 = vpop.xlane.xlu0 %1106 }
 0x7fc   : > { %v1111_v53 = vmul.f32 0.03125, %v1107_v52 }
 0x7fd   : > { %v1110_v54 = vpop.xlane.xlu1 %1109 }
 0x7fe   : > { %v1113_v55 = vadd.f32 1e-05, %v1111_v53  ;;  %v1112_v56 = vmul.f32 0.03125, %v1110_v54 }
 0x800   : > { %1684 = vrsqrt.f32 %v1113_v55  ;;  %v1114_v57 = vadd.f32 1e-05, %v1112_v56 }
 0x802   : > { %1686 = vrsqrt.f32 %v1114_v57 }
 0x80a   : > { %v1685_v58 = vpop.eup %1684 }
 0x80b   : > { %v1117_v60 = vmul.f32 %v1685_v58, %v1101_v7  ;;  %v1671_v58 = vld [vmem:[%s2027_s17 + $0x8] sm:$0xff]  }
 0x80c   : > { %v1687_v61 = vpop.eup %1686 }
 0x80d   : > { %v1125_v62 = vmul.f32 %v1509_v59, %v1117_v60  ;;  %v1118_v63 = vmul.f32 %v1687_v61, %v1102_v46 }
 0x80f   : > { %v1126_v2 = vmul.f32 %v1509_v59, %v1118_v63  ;;  %v1133_v3 = vadd.f32 %v1510_v0, %v1125_v62 }
 0x811   : > { %v1134_v4 = vadd.f32 %v1510_v0, %v1126_v2 }
 0x813   : > { %v1135_v5 = vpack.c.bf16 %v1134_v4, %v1133_v3  ;;  %v1521_v3 = vld [vmem:[%s2025_s15] ss:$0 sm:$0xff] }
 0x815   : > { %1619 = vmatmul.mubr.msk.bf16.vlgmr.msra.gmra.mrb[12].mxu0 %vm687_vm2, %v1135_v5 }
 0x816   : > { %1638 = vmatprep.mubr.msk.bf16.mxu0 %vm1705_vm0, %v1704_v1 }
 0x8e8   : > { %v1196_v13 = vpop.f32.mrb[12].mxu0 }
 0x8e9   : > { %v1197_v14 = vadd.f32 %v1511_v12, %v1196_v13  ;;  %v1620_v15 = vpop.f32.mrb[13].mxu0 }
 0x8ea   : > { %v1199_v16 = vpop.f32.mrb[14].mxu0 }
 0x8eb   : > { %v1203_v17 = vmul.f32 %v1197_v14, %v1197_v14  ;;  %v1200_v18 = vadd.f32 %v1511_v12, %v1199_v16  ;;  %v1621_v19 = vpop.f32.mrb[15].mxu0 }
 0x8ed   : > { %v1205_v20 = vmul.f32 %v1203_v17, %v1197_v14  ;;  %v1204_v21 = vmul.f32 %v1200_v18, %v1200_v18 }
 0x8ef   : > { %v1207_v22 = vmul.f32 0.044715, %v1205_v20  ;;  %v1206_v23 = vmul.f32 %v1204_v21, %v1200_v18 }
 0x8f1   : > { %v1209_v24 = vadd.f32 %v1207_v22, %v1197_v14  ;;  %v1208_v25 = vmul.f32 0.044715, %v1206_v23 }
 0x8f3   : > { %v1211_v26 = vmul.f32 0.7978846, %v1209_v24  ;;  %v1210_v27 = vadd.f32 %v1208_v25, %v1200_v18  ;;  %v1368_v24 = vld [vmem:[%s2028_s18] sm:$0x1] }
 0x8f5   : > { %1688 = vtanh.f32 %v1211_v26  ;;  %v1212_v28 = vmul.f32 0.7978846, %v1210_v27 }
 0x8f7   : > { %1690 = vtanh.f32 %v1212_v28 }
 0x8ff   : > { %v1689_v29 = vpop.eup %1688 }
 0x900   : > { %v1215_v30 = vadd.f32 1.0, %v1689_v29 }
 0x901   : > { %v1691_v31 = vpop.eup %1690 }
 0x902   : > { %v1217_v32 = vmul.f32 0.5, %v1215_v30  ;;  %v1216_v33 = vadd.f32 1.0, %v1691_v31 }
 0x904   : > { %v1218_v34 = vmul.f32 0.5, %v1216_v33  ;;  %v1219_v36 = vmul.f32 %v1217_v32, %v1197_v14 }
 0x906   : > { %v1220_v37 = vmul.f32 %v1218_v34, %v1200_v18 }
 0x908   : > { %v1221_v39 = vpack.c.bf16 %v1220_v37, %v1219_v36 }
 0x90a   : > { %1631 = vmatmul.mubr.msk.bf16.vlgmr.msra.gmra.mrb[16].mxu1 %vm1261_vm4, %v1221_v39 }
 0x9dd   : > { %v1299_v41 = vpop.f32.mrb[16].mxu1 }
 0x9de   : > { %v1300_v42 = vadd.f32 %v1515_v40, %v1299_v41  ;;  %v1632_v43 = vpop.f32.mrb[17].mxu1 }
 0x9df   : > { %v1302_v44 = vpop.f32.mrb[18].mxu1 }
 0x9e0   : > { %v1303_v7 = vadd.f32 %v1515_v40, %v1302_v44  ;;  %v1633_v45 = vpop.f32.mrb[19].mxu1  ;;  %v1306_v46 = vadd.f32 %v1300_v42, %v1921_v35 }
 0x9e2   : > { %v1310_v47 = vsel %vm687_vm2, %v1306_v46, 0.0  ;;  %v1307_v10 = vadd.f32 %v1303_v7, %v1924_v38  ;;  %v1670_v38 = vld [vmem:[%s2027_s17] sm:$0xff]  }
 0x9e3   : > { %1311 = vadd.xlane.f32.xlu0 %v1310_v47  ;;  %1635 = vmatpush3.bf16.msra.mxu0 %v1670_v38 }
 0x9e4   : > { %v1313_v48 = vsel %vm687_vm2, %v1307_v10, 0.0  ;;  %1636 = vmatprep.subr.bf16.mxu0 %v1704_v1 }
 0x9e5   : > { %1314 = vadd.xlane.f32.xlu1 %v1313_v48 }
 0x9e7   : > { %1637 = vmatpush3.bf16.msra.mxu0 %v1671_v58 }
 0xa70   : > { %v1312_v49 = vpop.xlane.xlu0 %1311 }
 0xa71   : > { %v1316_v50 = vmul.f32 0.03125, %v1312_v49 }
 0xa72   : > { %v1315_v51 = vpop.xlane.xlu1 %1314 }
 0xa73   : > { %v1318_v52 = vsub.f32 %v1306_v46, %v1316_v50  ;;  %v1317_v53 = vmul.f32 0.03125, %v1315_v51 }
 0xa75   : > { %v1319_v54 = vsub.f32 %v1307_v10, %v1317_v53  ;;  %v1320_v55 = vmul.f32 %v1318_v52, %v1318_v52 }
 0xa77   : > { %v1322_v56 = vsel %vm687_vm2, %v1320_v55, 0.0  ;;  %v1321_v57 = vmul.f32 %v1319_v54, %v1319_v54 }
 0xa78   : > { %1323 = vadd.xlane.f32.xlu0 %v1322_v56 }
 0xa79   : > { %v1325_v35 = vsel %vm687_vm2, %v1321_v57, 0.0 }
 0xa7a   : > { %1326 = vadd.xlane.f32.xlu1 %v1325_v35 }
 0xb05   : > { %v1324_v59 = vpop.xlane.xlu0 %1323 }
 0xb06   : > { %v1328_v60 = vmul.f32 0.03125, %v1324_v59 }
 0xb07   : > { %v1327_v61 = vpop.xlane.xlu1 %1326 }
 0xb08   : > { %v1330_v62 = vadd.f32 1e-05, %v1328_v60  ;;  %v1329_v63 = vmul.f32 0.03125, %v1327_v61 }
 0xb0a   : > { %1692 = vrsqrt.f32 %v1330_v62  ;;  %v1331_v0 = vadd.f32 1e-05, %v1329_v63 }
 0xb0c   : > { %1694 = vrsqrt.f32 %v1331_v0 }
 0xb14   : > { %v1693_v2 = vpop.eup %1692 }
 0xb15   : > { %v1334_v4 = vmul.f32 %v1693_v2, %v1318_v52 }
 0xb16   : > { %v1695_v5 = vpop.eup %1694 }
 0xb17   : > { %v1342_v1 = vmul.f32 %v1521_v3, %v1334_v4  ;;  %v1335_v8 = vmul.f32 %v1695_v5, %v1319_v54 }
 0xb19   : > { %v1350_v9 = vadd.f32 %v1522_v6, %v1342_v1  ;;  %v1343_v11 = vmul.f32 %v1521_v3, %v1335_v8 }
 0xb1b   : > { %v1351_v12 = vadd.f32 %v1522_v6, %v1343_v11  ;;  %v1352_v13 = vsel %vm687_vm2, %v1350_v9, 0.0 }
 0xb1d   : > { %v1353_v14 = vsel %vm687_vm2, %v1351_v12, 0.0 }
 0xb1e   : > { %v1354_v15 = vadd.f32 %v1353_v14, %v1352_v13 }
 0xb20   : > { %v1355_v16 = vrot.slane %v1354_v15, 4 }
 0xb22   : > { %v1356_v17 = vadd.f32 %v1355_v16, %v1354_v15 }
 0xb24   : > { %v1357_v18 = vrot.slane %v1356_v17, 2 }
 0xb26   : > { %v1358_v19 = vadd.f32 %v1357_v18, %v1356_v17 }
 0xb28   : > { %v1359_v20 = vrot.slane %v1358_v19, 1 }
 0xb2a   : > { %v1360_v21 = vadd.f32 %v1359_v20, %v1358_v19 }
 0xb2c   : > { %v1362_v22 = vmul.f32 0.0625, %v1360_v21 }
 0xb2e   : > { %v1363_v23 = vpack.c.bf16 %v1362_v22, %v1362_v22 }
 0xb30   : > { %1639 = vmatmul.mubr.msk.bf16.vlgmr.msra.gmra.mrb[16].mxu0 %vm687_vm2, %v1363_v23 }
 0xc03   : > { %v1418_v25 = vpop.f32.mrb[16].mxu0 }
 0xc04   : > { %v1419_v26 = vadd.f32 %v1418_v25, %v1368_v24  ;;  %v1640_v27 = vpop.f32.mrb[17].mxu0 }
 0xc05   : > { %v1421_v28 = vpop.f32.mrb[18].mxu0 }
 0xc06   : > { %1425 = vst [vmem:[%s1990_s24] sm:$0x1] %v1419_v26  ;;  %v1641_v29 = vpop.f32.mrb[19].mxu0 }
 0xc07 PF: > { %s29_s0 = sadd.s32 1, %s1702_s0  }
 0xc08   : > { %p26_p4 = scmp.ge.s32.totalorder %s29_s0, 4  }
 0xc0a   :  { %28 = sbr.rel (!%p26_p4) target bundleno = 5 (0x5), region = 126 }

</bundles_post_ra>
